<compile_context>
chip_gen: v7x
topology: tpu7x:2x2x1
jax: 0.10.0
libtpu: 0.0.40
codegen_flags: <defaults>
</compile_context>

<pallas_src>
import functools

import jax
import jax.numpy as jnp
from jax.experimental import pallas as pl
from jax.experimental.pallas import tpu as pltpu

STATE_DIM = 16
GOAL_DIM = 8
IN_DIM = STATE_DIM + GOAL_DIM      # 24
HIDDEN = 300
OUT_DIM = 1

IN_PAD = 128                       # lane-aligned input width
HIDDEN_PAD = 384                   # 3 * 128


def _round_up(n, m):
    return ((n + m - 1) // m) * m


def _default_elementwise_dtype():
    """bf16 bias-add/ReLU on chips with a bf16 VPU (v6e/v7x); f32 on v5-class.

    Purely a performance choice: both paths are numerically valid on every
    generation (Mosaic widens bf16 elementwise ops on chips without bf16 VPU).
    """
    try:
        kind = jax.devices()[0].device_kind.lower()
    except Exception:
        return jnp.float32
    for old in ("v2", "v3", "v4", "v5"):
        if old in kind:
            return jnp.float32
    return jnp.bfloat16


# ---------------------------------------------------------------------------
# Kernel
# ---------------------------------------------------------------------------
def _value_function_kernel(xg_ref, w1_ref, b1_ref, w2_ref, b2_ref,
                           w3_ref, b3_ref, out_ref, *, ew_dtype):
    # Layer 1: (tile, 128) bf16 @ (128, 384) bf16 -> f32 accumulate on the MXU.
    h1 = jnp.dot(xg_ref[...], w1_ref[...],
                 preferred_element_type=jnp.float32).astype(ew_dtype)
    h1 = jnp.maximum(h1 + b1_ref[...], 0).astype(jnp.bfloat16)

    # Layer 2: (tile, 384) @ (384, 384).
    h2 = jnp.dot(h1, w2_ref[...],
                 preferred_element_type=jnp.float32).astype(ew_dtype)
    h2 = jnp.maximum(h2 + b2_ref[...], 0).astype(jnp.bfloat16)

    # Layer 3: 300 -> 1.  Only one real output column, so skip the MXU and use
    # a VPU broadcast-multiply + f32 lane reduction (XLU), producing the
    # compact (tile, 1) value column directly.
    prod = (h2 * w3_ref[...]).astype(jnp.float32)              # (tile, 384)
    v = jnp.sum(prod, axis=-1, keepdims=True) + b3_ref[...]    # (tile, 1)
    out_ref[...] = v.astype(out_ref.dtype)


# ---------------------------------------------------------------------------
# Wrapper
# ---------------------------------------------------------------------------
def value_function_forward(x, g=None, params=None, *, batch_tile=None,
                           elementwise_dtype=None):
    """Forward pass.  `params` is the dict produced by prep_params()."""
    in_dim = params["in_dim"]
    B = x.shape[0]
    if g is not None:
        assert g.shape[0] == B, (x.shape, g.shape)
        feat = x.shape[1] + g.shape[1]
    else:
        feat = x.shape[1]
    assert feat == in_dim, f"expected input width {in_dim}, got {feat}"

    if B == 0:
        return jnp.zeros((0, OUT_DIM), jnp.float32)

    if batch_tile is None:
        batch_tile = min(512, _round_up(B, 16))
    elif batch_tile <= 0 or batch_tile % 16 != 0:
        raise ValueError(
            f"batch_tile must be a positive multiple of 16, got {batch_tile}")
    Bp = _round_up(B, batch_tile)
    grid = (Bp // batch_tile,)

    ew_dtype = (elementwise_dtype if elementwise_dtype is not None
                else _default_elementwise_dtype())

    # Fused concat + zero-pad + bf16 cast: one lane-dense (Bp, 128) bf16 slab.
    slab = jnp.zeros((Bp, IN_PAD), jnp.bfloat16)
    slab = slab.at[:B, :x.shape[1]].set(x.astype(jnp.bfloat16))
    if g is not None:
        slab = slab.at[:B, x.shape[1]:feat].set(g.astype(jnp.bfloat16))

    w1, w2 = params["w1"], params["w2"]
    w3 = params["w3_row"]                              # (1, HIDDEN_PAD) bf16
    b1 = params["b1"].astype(ew_dtype)                 # tiny casts
    b2 = params["b2"].astype(ew_dtype)
    b3 = params["b3"]                                  # (1, 1) f32

    def bspec_batched(width):
        return pl.BlockSpec((batch_tile, width), lambda i: (i, 0))

    def bspec_full(shape):
        return pl.BlockSpec(shape, lambda i: (0,) * len(shape))

    # Advisory cost hint for the XLA scheduler.
    flops = Bp * (2 * (IN_PAD * HIDDEN_PAD + HIDDEN_PAD * HIDDEN_PAD)
                  + 2 * HIDDEN_PAD)
    operands = (slab, w1, b1, w2, b2, w3, b3)
    bytes_accessed = (sum(a.size * a.dtype.itemsize for a in operands)
                      + Bp * OUT_DIM * 4)
    cost = pl.CostEstimate(flops=int(flops), transcendentals=0,
                           bytes_accessed=int(bytes_accessed))

    kernel = functools.partial(_value_function_kernel, ew_dtype=ew_dtype)

    out = pl.pallas_call(
        kernel,
        out_shape=jax.ShapeDtypeStruct((Bp, OUT_DIM), jnp.float32),
        grid_spec=pltpu.PrefetchScalarGridSpec(
            num_scalar_prefetch=0,
            grid=grid,
            in_specs=[
                bspec_batched(IN_PAD),     # xg   (tile, 128)   bf16
                bspec_full(w1.shape),      # W1   (128, 384)    bf16
                bspec_full(b1.shape),      # b1   (1, 384)      ew_dtype
                bspec_full(w2.shape),      # W2   (384, 384)    bf16
                bspec_full(b2.shape),      # b2   (1, 384)      ew_dtype
                bspec_full(w3.shape),      # W3   (1, 384)      bf16
                bspec_full(b3.shape),      # b3   (1, 1)        f32
            ],
            out_specs=bspec_batched(OUT_DIM),
        ),
        compiler_params=pltpu.CompilerParams(
            dimension_semantics=("parallel",)),
        cost_estimate=cost,
    )(*operands)

    # Drop batch padding (tiny (Bp, 1) array).
    return out[:B]


# ---------------------------------------------------------------------------
# Parameters
# ---------------------------------------------------------------------------
def init_params(key, state_dim=STATE_DIM, goal_dim=GOAL_DIM):
    """Logical f32 parameters, stored pre-transposed as (in, out) / (1, out)."""
    in_dim = state_dim + goal_dim
    ks = jax.random.split(key, 6)

    def unif(k, shape, fan_in):
        bound = 1.0 / jnp.sqrt(fan_in)
        return jax.random.uniform(k, shape, jnp.float32, -bound, bound)

    w1 = unif(ks[0], (in_dim, HIDDEN), in_dim)
    b1 = unif(ks[1], (1, HIDDEN), in_dim)
    w2 = unif(ks[2], (HIDDEN, HIDDEN), HIDDEN)
    b2 = unif(ks[3], (1, HIDDEN), HIDDEN)
    w3 = unif(ks[4], (HIDDEN, OUT_DIM), HIDDEN)
    b3 = unif(ks[5], (1, OUT_DIM), HIDDEN)
    return (w1, b1, w2, b2, w3, b3)


def prep_params(logical_params):
    """Zero-pad to lane-aligned shapes and cast matmul operands to bf16."""
    w1, b1, w2, b2, w3, b3 = logical_params
    in_dim = w1.shape[0]
    assert in_dim <= IN_PAD, in_dim

    def pad2(a, rows, cols, dtype):
        out = jnp.zeros((rows, cols), jnp.float32)
        out = out.at[:a.shape[0], :a.shape[1]].set(a)
        return out.astype(dtype)

    return {
        "in_dim": in_dim,
        "w1": pad2(w1, IN_PAD, HIDDEN_PAD, jnp.bfloat16),
        "b1": pad2(b1, 1, HIDDEN_PAD, jnp.float32),
        "w2": pad2(w2, HIDDEN_PAD, HIDDEN_PAD, jnp.bfloat16),
        "b2": pad2(b2, 1, HIDDEN_PAD, jnp.float32),
        # W3 stored as a broadcastable row vector for the VPU layer-3 path.
        "w3_row": pad2(w3.T, 1, HIDDEN_PAD, jnp.bfloat16),
        "b3": b3.astype(jnp.float32),                  # (1, 1)
    }


# ---------------------------------------------------------------------------
# Pure-f32 reference (true PyTorch-equivalent forward)
# ---------------------------------------------------------------------------
def reference_forward(x, g, logical_params):
    w1, b1, w2, b2, w3, b3 = logical_params
    xu = jnp.concatenate([x, g], axis=1) if g is not None else x
    h1 = jax.nn.relu(xu @ w1 + b1)
    h2 = jax.nn.relu(h1 @ w2 + b2)
    return h2 @ w3 + b3


if __name__ == "__main__":
    key = jax.random.PRNGKey(0)
    k_x, k_g, k_p, k_x2, k_g2 = jax.random.split(key, 5)

    logical = init_params(k_p)
    params = prep_params(logical)

    # --- small batch (exercises batch padding 8 -> 16 rows) -----------------
    B1 = 8
    x1 = jax.random.normal(k_x, (B1, STATE_DIM), jnp.float32)
    g1 = jax.random.normal(k_g, (B1, GOAL_DIM), jnp.float32)

    out1 = jax.block_until_ready(value_function_forward(x1, g1, params))
    ref1 = reference_forward(x1, g1, logical)
    assert out1.shape == (B1, OUT_DIM), out1.shape
    # bf16 matmul operands vs true f32 reference: honest, looser tolerance.
    assert jnp.allclose(out1, ref1, atol=5e-2, rtol=5e-2), (
        "mismatch vs f32 reference: max abs diff "
        f"{float(jnp.max(jnp.abs(out1 - ref1)))}")

    # --- g=None path (caller passes pre-concatenated input) -----------------
    xu1 = jnp.concatenate([x1, g1], axis=1)
    out1b = jax.block_until_ready(value_function_forward(xu1, None, params))
    assert jnp.allclose(out1b, out1, atol=1e-6, rtol=1e-6)

    # --- larger batch: multi-step grid (batch_tile=512 -> grid=(2,)) --------
    B2 = 1000
    x2 = jax.random.normal(k_x2, (B2, STATE_DIM), jnp.float32)
    g2 = jax.random.normal(k_g2, (B2, GOAL_DIM), jnp.float32)
    out2 = jax.block_until_ready(value_function_forward(x2, g2, params))
    ref2 = reference_forward(x2, g2, logical)
    assert out2.shape == (B2, OUT_DIM), out2.shape
    assert jnp.allclose(out2, ref2, atol=5e-2, rtol=5e-2), (
        "mismatch vs f32 reference (large batch): max abs diff "
        f"{float(jnp.max(jnp.abs(out2 - ref2)))}")

    print("KERNEL_OK")
</pallas_src>

<mosaic_0001>
module attributes {stable_mosaic.version = 11 : i64} {
  func.func @_value_function_kernel(%arg0: i32, %arg1: memref<16x128xbf16, #tpu.memory_space<vmem>>, %arg2: memref<128x384xbf16, #tpu.memory_space<vmem>>, %arg3: memref<1x384xbf16, #tpu.memory_space<vmem>>, %arg4: memref<384x384xbf16, #tpu.memory_space<vmem>>, %arg5: memref<1x384xbf16, #tpu.memory_space<vmem>>, %arg6: memref<1x384xbf16, #tpu.memory_space<vmem>>, %arg7: memref<1x1xf32, #tpu.memory_space<vmem>>, %arg8: memref<16x1xf32, #tpu.memory_space<vmem>>) attributes {dimension_semantics = [#tpu.dimension_semantics<parallel>], iteration_bounds = array<i64: 1>, scalar_prefetch = 0 : i64, scratch_operands = 0 : i64, tpu.core_type = #tpu.core_type<tc>, window_params = [{transform_indices = @transform_0, window_bounds = array<i64: 16, 128>}, {pipeline_mode = #tpu.pipeline_mode<synchronous>, transform_indices = @transform_1, window_bounds = array<i64: 128, 384>}, {pipeline_mode = #tpu.pipeline_mode<synchronous>, transform_indices = @transform_2, window_bounds = array<i64: 1, 384>}, {pipeline_mode = #tpu.pipeline_mode<synchronous>, transform_indices = @transform_3, window_bounds = array<i64: 384, 384>}, {pipeline_mode = #tpu.pipeline_mode<synchronous>, transform_indices = @transform_4, window_bounds = array<i64: 1, 384>}, {pipeline_mode = #tpu.pipeline_mode<synchronous>, transform_indices = @transform_5, window_bounds = array<i64: 1, 384>}, {pipeline_mode = #tpu.pipeline_mode<synchronous>, transform_indices = @transform_6, window_bounds = array<i64: 1, 1>}, {transform_indices = @transform_7, window_bounds = array<i64: 16, 1>}]} {
    %c0 = arith.constant 0 : index
    %c0_0 = arith.constant 0 : index
    %0 = vector.load %arg1[%c0, %c0_0] : memref<16x128xbf16, #tpu.memory_space<vmem>>, vector<16x128xbf16>
    %c0_1 = arith.constant 0 : index
    %c0_2 = arith.constant 0 : index
    %1 = vector.load %arg2[%c0_1, %c0_2] : memref<128x384xbf16, #tpu.memory_space<vmem>>, vector<128x384xbf16>
    %cst = arith.constant dense<0.000000e+00> : vector<16x384xf32>
    %2 = tpu.matmul %0, %1, %cst {dimension_numbers = #tpu.dot_dimension_numbers<[1], [0], [0], [1], [0, 0, 1, 1], [], []>} : vector<16x128xbf16>, vector<128x384xbf16>, vector<16x384xf32> -> vector<16x384xf32>
    %3 = arith.truncf %2 : vector<16x384xf32> to vector<16x384xbf16>
    %c0_3 = arith.constant 0 : index
    %c0_4 = arith.constant 0 : index
    %4 = vector.load %arg3[%c0_3, %c0_4] : memref<1x384xbf16, #tpu.memory_space<vmem>>, vector<1x384xbf16>
    %5 = vector.broadcast %4 : vector<1x384xbf16> to vector<16x384xbf16>
    %6 = arith.addf %3, %5 : vector<16x384xbf16>
    %cst_5 = arith.constant 0.000000e+00 : bf16
    %7 = vector.broadcast %cst_5 : bf16 to vector<16x384xbf16>
    %8 = arith.maximumf %6, %7 : vector<16x384xbf16>
    %c0_6 = arith.constant 0 : index
    %c0_7 = arith.constant 0 : index
    %9 = vector.load %arg4[%c0_6, %c0_7] : memref<384x384xbf16, #tpu.memory_space<vmem>>, vector<384x384xbf16>
    %cst_8 = arith.constant dense<0.000000e+00> : vector<16x384xf32>
    %10 = tpu.matmul %8, %9, %cst_8 {dimension_numbers = #tpu.dot_dimension_numbers<[1], [0], [0], [1], [0, 0, 1, 1], [], []>} : vector<16x384xbf16>, vector<384x384xbf16>, vector<16x384xf32> -> vector<16x384xf32>
    %11 = arith.truncf %10 : vector<16x384xf32> to vector<16x384xbf16>
    %c0_9 = arith.constant 0 : index
    %c0_10 = arith.constant 0 : index
    %12 = vector.load %arg5[%c0_9, %c0_10] : memref<1x384xbf16, #tpu.memory_space<vmem>>, vector<1x384xbf16>
    %13 = vector.broadcast %12 : vector<1x384xbf16> to vector<16x384xbf16>
    %14 = arith.addf %11, %13 : vector<16x384xbf16>
    %cst_11 = arith.constant 0.000000e+00 : bf16
    %15 = vector.broadcast %cst_11 : bf16 to vector<16x384xbf16>
    %16 = arith.maximumf %14, %15 : vector<16x384xbf16>
    %c0_12 = arith.constant 0 : index
    %c0_13 = arith.constant 0 : index
    %17 = vector.load %arg6[%c0_12, %c0_13] : memref<1x384xbf16, #tpu.memory_space<vmem>>, vector<1x384xbf16>
    %18 = vector.broadcast %17 : vector<1x384xbf16> to vector<16x384xbf16>
    %19 = arith.mulf %16, %18 : vector<16x384xbf16>
    %20 = arith.extf %19 : vector<16x384xbf16> to vector<16x384xf32>
    %cst_14 = arith.constant dense<0.000000e+00> : vector<16xf32>
    %21 = vector.multi_reduction <add>, %20, %cst_14 [1] : vector<16x384xf32> to vector<16xf32>
    %22 = vector.shape_cast %21 : vector<16xf32> to vector<16x1xf32>
    %c0_15 = arith.constant 0 : index
    %c0_16 = arith.constant 0 : index
    %23 = vector.load %arg7[%c0_15, %c0_16] : memref<1x1xf32, #tpu.memory_space<vmem>>, vector<1x1xf32>
    %24 = vector.broadcast %23 : vector<1x1xf32> to vector<16x1xf32>
    %25 = arith.addf %22, %24 : vector<16x1xf32>
    %c0_17 = arith.constant 0 : index
    %c0_18 = arith.constant 0 : index
    %26 = vector.load %arg8[%c0_17, %c0_18] : memref<16x1xf32, #tpu.memory_space<vmem>>, vector<16x1xf32>
    tpu.vector_store %arg8[%c0_17, %c0_18], %25 {strides = array<i32>} : memref<16x1xf32, #tpu.memory_space<vmem>>, vector<16x1xf32>,
    return
  }
  func.func @transform_0(%arg0: i32) -> (i32, i32) {
    %c0_i32 = arith.constant 0 : i32
    %c0_i32_0 = arith.constant 0 : i32
    return %arg0, %c0_i32 : i32, i32
  }
  func.func @transform_1(%arg0: i32) -> (i32, i32) {
    %c0_i32 = arith.constant 0 : i32
    %c0_i32_0 = arith.constant 0 : i32
    %c0_i32_1 = arith.constant 0 : i32
    return %c0_i32, %c0_i32_0 : i32, i32
  }
  func.func @transform_2(%arg0: i32) -> (i32, i32) {
    %c0_i32 = arith.constant 0 : i32
    %c0_i32_0 = arith.constant 0 : i32
    %c0_i32_1 = arith.constant 0 : i32
    return %c0_i32, %c0_i32_0 : i32, i32
  }
  func.func @transform_3(%arg0: i32) -> (i32, i32) {
    %c0_i32 = arith.constant 0 : i32
    %c0_i32_0 = arith.constant 0 : i32
    %c0_i32_1 = arith.constant 0 : i32
    return %c0_i32, %c0_i32_0 : i32, i32
  }
  func.func @transform_4(%arg0: i32) -> (i32, i32) {
    %c0_i32 = arith.constant 0 : i32
    %c0_i32_0 = arith.constant 0 : i32
    %c0_i32_1 = arith.constant 0 : i32
    return %c0_i32, %c0_i32_0 : i32, i32
  }
  func.func @transform_5(%arg0: i32) -> (i32, i32) {
    %c0_i32 = arith.constant 0 : i32
    %c0_i32_0 = arith.constant 0 : i32
    %c0_i32_1 = arith.constant 0 : i32
    return %c0_i32, %c0_i32_0 : i32, i32
  }
  func.func @transform_6(%arg0: i32) -> (i32, i32) {
    %c0_i32 = arith.constant 0 : i32
    %c0_i32_0 = arith.constant 0 : i32
    %c0_i32_1 = arith.constant 0 : i32
    return %c0_i32, %c0_i32_0 : i32, i32
  }
  func.func @transform_7(%arg0: i32) -> (i32, i32) {
    %c0_i32 = arith.constant 0 : i32
    %c0_i32_0 = arith.constant 0 : i32
    return %arg0, %c0_i32 : i32, i32
  }
}

</mosaic_0001>

<bundles_post_ra>
// kernel: tpu_custom_call.1
= control target key start
LH: loop header
LB: loop body
LE: loop exit
PB: predicated region body
PF: predicated region fallthrough
CT: control target
= control target key end

     0   :  { %s1714_s0 = inlined_call_operand.hbm [shape: bf16[16,128], index: 0, kind: input, shape index: {}]   ;;  %s1715_s1 = inlined_call_operand.hbm [shape: bf16[128,384], index: 1, kind: input, shape index: {}]   ;;  %s1716_s2 = inlined_call_operand.vmem [shape: bf16[1,384], index: 2, kind: input, shape index: {}]   ;;  %s1717_s3 = inlined_call_operand.hbm [shape: bf16[384,384], index: 3, kind: input, shape index: {}]   ;;  %s1718_s4 = inlined_call_operand.vmem [shape: bf16[1,384], index: 4, kind: input, shape index: {}]   ;;  %s1719_s5 = inlined_call_operand.vmem [shape: bf16[1,384], index: 5, kind: input, shape index: {}]   ;;  %s1720_s6 = inlined_call_operand.<no memory space> [shape: f32[1,1], index: 6, kind: input, shape index: {}]   ;;  %s1721_s7 = inlined_call_operand.vmem [shape: f32[16,1], index: 7, kind: output, shape index: {}]  }
   0x1   :  { %v12_v0 = vstv %s1720_s6 }
   0x2   :  { %13 = vst [vmem:[#allocation2] sm:$0x1] %v12_v0 }
   0x3   :  { %14 = vsyncpa [#allocation4], 0 }
   0x4   :  { %15 = vsyncpa [#allocation6], 0  ;;  %s1556_s26 = smov [#allocation5]   ;;  %s1486_s30 = scalar_lea.hbm %s1715_s1, 3072 }
   0x5   :  { %s33_s27 = sshll.u32 %s1556_s26, 4  ;;  %p1487_p0 = scmp.ne.s32.totalorder %s1715_s1, %s1486_s30  ;;  %s34_s27 = int_to_ptr.vmem [resolvable:$true] %s33_s27 }
   0x6   :  { %p1490_p1 = scmp.lt.u32.totalorder %s1486_s30, %s1715_s1 }
   0x8   :  { %p1492_p2 = pnand %p1490_p1, %p1487_p0 }
   0xa   :  { %1495 = shalt.err (!%p1492_p2)
}
   0xb   :  { %s1496_s6 = scalar_lea.vmem %s34_s27, 3072  ;;  %p1501_p4 = scmp.lt.s32.totalorder %s34_s27, %s34_s27 }
   0xc   :  { %p1497_p3 = scmp.ne.s32.totalorder %s34_s27, %s1496_s6  ;;  %p1502_p5 = scmp.lt.s32.totalorder %s1496_s6, %s1496_s6 }
   0xe   :  { %p1503_p6 = por %p1502_p5, %p1501_p4 }
  0x10   :  { %p1504_p7 = pnand %p1503_p6, %p1497_p3 }
  0x12   :  { %1507 = shalt.err (!%p1504_p7)
}
  0x13   :  { %s1557_s12 = smov 192   ;;  %s1558_s13 = smov 12  }
  0x14   :  { %39 = dma.hbm_to_vmem [thread:$0]  %s1715_s1, 3072, %s34_s27, [#allocation6], %s1557_s12, %s1557_s12, %s1558_s13  }
  0x15   :  { %s1559_s16 = smov [#allocation3]   ;;  %s1508_s20 = scalar_lea.hbm %s1714_s0, 128 }
  0x16   :  { %s21_s17 = sshll.u32 %s1559_s16, 4  ;;  %p1509_p8 = scmp.ne.s32.totalorder %s1714_s0, %s1508_s20  ;;  %s22_s17 = int_to_ptr.vmem [resolvable:$true] %s21_s17 }
  0x17   :  { %p1512_p9 = scmp.lt.u32.totalorder %s1508_s20, %s1714_s0 }
  0x19   :  { %p1514_p10 = pnand %p1512_p9, %p1509_p8 }
  0x1b   :  { %1517 = shalt.err (!%p1514_p10)
}
  0x1c   :  { %s1518_s25 = scalar_lea.vmem %s22_s17, 128  ;;  %p1523_p12 = scmp.lt.s32.totalorder %s22_s17, %s22_s17 }
  0x1d   :  { %p1519_p11 = scmp.ne.s32.totalorder %s22_s17, %s1518_s25  ;;  %p1524_p13 = scmp.lt.s32.totalorder %s1518_s25, %s1518_s25 }
  0x1f   :  { %p1525_p0 = por %p1524_p13, %p1523_p12 }
  0x21   :  { %p1526_p1 = pnand %p1525_p0, %p1519_p11 }
  0x23   :  { %1529 = shalt.err (!%p1526_p1)
}
  0x24   :  { %s1560_s1 = smov 64   ;;  %s1561_s26 = smov 4  }
  0x25   :  { %27 = dma.hbm_to_vmem [thread:$0]  %s1714_s0, 128, %s22_s17, [#allocation4], %s1560_s1, %s1560_s1, %s1561_s26  }
  0x26   :  { %s1562_s29 = smov [#allocation7]   ;;  %s1530_s10 = scalar_lea.hbm %s1717_s3, 9216 }
  0x27   :  { %s47_s30 = sshll.u32 %s1562_s29, 4  ;;  %p1531_p2 = scmp.ne.s32.totalorder %s1717_s3, %s1530_s10  ;;  %s48_s30 = int_to_ptr.vmem [resolvable:$true] %s47_s30 }
  0x28   :  { %p1534_p3 = scmp.lt.u32.totalorder %s1530_s10, %s1717_s3 }
  0x2a   :  { %p1536_p4 = pnand %p1534_p3, %p1531_p2 }
  0x2c   :  { %1539 = shalt.err (!%p1536_p4)
}
  0x2d   :  { %s1540_s16 = scalar_lea.vmem %s48_s30, 9216  ;;  %p1545_p6 = scmp.lt.s32.totalorder %s48_s30, %s48_s30 }
  0x2e   :  { %p1541_p5 = scmp.ne.s32.totalorder %s48_s30, %s1540_s16  ;;  %p1546_p7 = scmp.lt.s32.totalorder %s1540_s16, %s1540_s16 }
  0x30   :  { %p1547_p8 = por %p1546_p7, %p1545_p6 }
  0x32   :  { %p1548_p9 = pnand %p1547_p8, %p1541_p5 }
  0x34   :  { %1551 = shalt.err (!%p1548_p9)
}
  0x35   :  { %53 = dma.hbm_to_vmem [thread:$0]  %s1717_s3, 9216, %s48_s30, [#allocation6], %s1557_s12, %s1557_s12, %s1558_s13  }
  0x36   :  { %1552 = dma.done.wait [#allocation4], 128  }
  0x37   :  { %1553 = vsyncadd [#allocation4], 4294967168 }
  0x38   :  { %1554 = dma.done.wait [#allocation6], 12288  }
  0x39   :  { %1555 = vsyncadd [#allocation6], 4294955008  ;;  %v1563_v1 = vmov 0.0   ;;  %v1564_v2 = vmov 0   ;;  %vm1565_vm0 = vmmov 0   ;;  %v1382_v26 = vld [vmem:[#allocation3] sm:$0xff]  }
  0x3a   :  { %1302 = vmatprep.subr.bf16.mxu1 %v1563_v1  ;;  %270 = vmatprep.mubr.bf16.mxu0 %v1564_v2  ;;  %v1357_v3 = vld [vmem:[#allocation5 + $0x4] ss:$12 sps:$4 sm:$0xff]   ;;  %v1359_v4 = vld [vmem:[#allocation5] ss:$12 sps:$4 sm:$0xff]   ;;  %v1360_v5 = vld [vmem:[#allocation5 + $0x1c] ss:$12 sps:$4 sm:$0xff]  }
  0x3b   :  { %1318 = vmatprep.mubr.msk.bf16.mxu1 %vm1565_vm0, %v1563_v1  ;;  %238 = vmatprep.subr.bf16.mxu0 %v1357_v3  ;;  %v1362_v6 = vld [vmem:[#allocation5 + $0x18] ss:$12 sps:$4 sm:$0xff]   ;;  %v1363_v7 = vld [vmem:[#allocation5 + $0x34] ss:$12 sps:$4 sm:$0xff]   ;;  %v1365_v8 = vld [vmem:[#allocation5 + $0x30] ss:$12 sps:$4 sm:$0xff]  }
  0x3c   :  { %239 = vmatpush1.bf16.msra.mxu0 %v1359_v4  ;;  %v1366_v9 = vld [vmem:[#allocation5 + $0x4c] ss:$12 sps:$4 sm:$0xff]   ;;  %v1368_v10 = vld [vmem:[#allocation5 + $0x48] ss:$12 sps:$4 sm:$0xff]   ;;  %v1369_v12 = vld [vmem:[#allocation5 + $0x64] ss:$12 sps:$4 sm:$0xff]  }
  0x3d   :  { %240 = vmatprep.subr.bf16.mxu0 %v1360_v5  ;;  %v1381_v11 = vld [vmem:[#allocation5 + $0x8] ss:$12 sps:$4 sm:$0xff]   ;;  %v1383_v13 = vld [vmem:[#allocation5 + $0x20] ss:$12 sps:$4 sm:$0xff]   ;;  %v1384_v16 = vld [vmem:[#allocation5 + $0x38] ss:$12 sps:$4 sm:$0xff]  }
  0x3e   :  { %1303 = vmatpush3.bf16.msra.mxu1 %v1381_v11  ;;  %v1371_v14 = vld [vmem:[#allocation5 + $0x60] ss:$12 sps:$4 sm:$0xff]   ;;  %v1372_v15 = vld [vmem:[#allocation5 + $0x7c] ss:$12 sps:$4 sm:$0xff]   ;;  %v1374_v17 = vld [vmem:[#allocation5 + $0x78] ss:$12 sps:$4 sm:$0xff]  }
  0x3f   :  { %1304 = vmatprep.subr.bf16.mxu1 %v1563_v1  ;;  %v1375_v18 = vld [vmem:[#allocation5 + $0x94] ss:$12 sps:$4 sm:$0xff]   ;;  %v1385_v19 = vld [vmem:[#allocation5 + $0x50] ss:$12 sps:$4 sm:$0xff]   ;;  %v1378_v21 = vld [vmem:[#allocation5 + $0xac] ss:$12 sps:$4 sm:$0xff]  }
  0x40   :  { %241 = vmatpush1.bf16.msra.mxu0 %v1362_v6  ;;  %v1377_v20 = vld [vmem:[#allocation5 + $0x90] ss:$12 sps:$4 sm:$0xff]   ;;  %v1386_v22 = vld [vmem:[#allocation5 + $0x68] ss:$12 sps:$4 sm:$0xff]   ;;  %v1387_v25 = vld [vmem:[#allocation5 + $0x80] ss:$12 sps:$4 sm:$0xff]  }
  0x41   :  { %242 = vmatprep.subr.bf16.mxu0 %v1363_v7  ;;  %v1380_v23 = vld [vmem:[#allocation5 + $0xa8] ss:$12 sps:$4 sm:$0xff]   ;;  %v1392_v24 = vld [vmem:[#allocation7 + $0x4] ss:$12 sps:$4 sm:$0xff]   ;;  %v1390_v27 = vld [vmem:[#allocation7] ss:$12 sps:$4 sm:$0xff]  }
  0x42   :  { %1305 = vmatpush3.bf16.msra.mxu1 %v1383_v13  ;;  %v1395_v28 = vld [vmem:[#allocation7 + $0x1c] ss:$12 sps:$4 sm:$0xff]   ;;  %v1388_v29 = vld [vmem:[#allocation5 + $0x98] ss:$12 sps:$4 sm:$0xff]   ;;  %v1398_v31 = vld [vmem:[#allocation7 + $0x34] ss:$12 sps:$4 sm:$0xff]  }
  0x43   :  { %1306 = vmatprep.subr.bf16.mxu1 %v1563_v1  ;;  %v1393_v30 = vld [vmem:[#allocation7 + $0x18] ss:$12 sps:$4 sm:$0xff]   ;;  %v1389_v32 = vld [vmem:[#allocation5 + $0xb0] ss:$12 sps:$4 sm:$0xff]   ;;  %v1417_v33 = vld [vmem:[#allocation7 + $0xc8] ss:$12 sps:$4 sm:$0xff]  }
  0x44   :  { %243 = vmatpush1.bf16.msra.mxu0 %v1365_v8  ;;  %v1396_v34 = vld [vmem:[#allocation7 + $0x30] ss:$12 sps:$4 sm:$0xff]   ;;  %v1401_v35 = vld [vmem:[#allocation7 + $0x4c] ss:$12 sps:$4 sm:$0xff]   ;;  %v1418_v36 = vld [vmem:[#allocation7 + $0x8] ss:$12 sps:$4 sm:$0xff]  }
  0x45   :  { %244 = vmatprep.subr.bf16.mxu0 %v1366_v9  ;;  %v1422_v37 = vld [vmem:[#allocation7 + $0xe0] ss:$12 sps:$4 sm:$0xff]   ;;  %v1399_v38 = vld [vmem:[#allocation7 + $0x48] ss:$12 sps:$4 sm:$0xff]   ;;  %v1404_v39 = vld [vmem:[#allocation7 + $0x64] ss:$12 sps:$4 sm:$0xff]  }
  0x46   :  { %1307 = vmatpush3.bf16.msra.mxu1 %v1384_v16  ;;  %v1423_v40 = vld [vmem:[#allocation7 + $0x20] ss:$12 sps:$4 sm:$0xff]   ;;  %v1427_v41 = vld [vmem:[#allocation7 + $0xf8] ss:$12 sps:$4 sm:$0xff]   ;;  %v1407_v43 = vld [vmem:[#allocation7 + $0x7c] ss:$12 sps:$4 sm:$0xff]  }
  0x47   :  { %1308 = vmatprep.subr.bf16.mxu1 %v1563_v1  ;;  %v1402_v42 = vld [vmem:[#allocation7 + $0x60] ss:$12 sps:$4 sm:$0xff]   ;;  %v1405_v44 = vld [vmem:[#allocation7 + $0x78] ss:$12 sps:$4 sm:$0xff]   ;;  %v1432_v47 = vld [vmem:[#allocation7 + $0x110] ss:$12 sps:$4 sm:$0xff]  }
  0x48   :  { %245 = vmatpush1.bf16.msra.mxu0 %v1368_v10  ;;  %v1428_v45 = vld [vmem:[#allocation7 + $0x38] ss:$12 sps:$4 sm:$0xff]   ;;  %v1410_v46 = vld [vmem:[#allocation7 + $0x94] ss:$12 sps:$4 sm:$0xff]   ;;  %v1433_v48 = vld [vmem:[#allocation7 + $0x50] ss:$12 sps:$4 sm:$0xff]  }
  0x49   :  { %246 = vmatprep.subr.bf16.mxu0 %v1369_v12  ;;  %v1437_v49 = vld [vmem:[#allocation7 + $0x128] ss:$12 sps:$4 sm:$0xff]   ;;  %v1408_v50 = vld [vmem:[#allocation7 + $0x90] ss:$12 sps:$4 sm:$0xff]   ;;  %v1413_v51 = vld [vmem:[#allocation7 + $0xac] ss:$12 sps:$4 sm:$0xff]  }
  0x4a   :  { %1309 = vmatpush3.bf16.msra.mxu1 %v1385_v19  ;;  %v1438_v52 = vld [vmem:[#allocation7 + $0x68] ss:$12 sps:$4 sm:$0xff]   ;;  %v1442_v53 = vld [vmem:[#allocation7 + $0x140] ss:$12 sps:$4 sm:$0xff]   ;;  %v1416_v55 = vld [vmem:[#allocation7 + $0xc4] ss:$12 sps:$4 sm:$0xff]  }
  0x4b   :  { %1310 = vmatprep.subr.bf16.mxu1 %v1563_v1  ;;  %v1411_v54 = vld [vmem:[#allocation7 + $0xa8] ss:$12 sps:$4 sm:$0xff]   ;;  %v1443_v56 = vld [vmem:[#allocation7 + $0x80] ss:$12 sps:$4 sm:$0xff]   ;;  %v1419_v59 = vld [vmem:[#allocation7 + $0xd8] ss:$12 sps:$4 sm:$0xff]  }
  0x4c   :  { %247 = vmatpush1.bf16.msra.mxu0 %v1371_v14  ;;  %v1414_v57 = vld [vmem:[#allocation7 + $0xc0] ss:$12 sps:$4 sm:$0xff]   ;;  %v1421_v58 = vld [vmem:[#allocation7 + $0xdc] ss:$12 sps:$4 sm:$0xff]   ;;  %v1436_v0 = vld [vmem:[#allocation7 + $0x124] ss:$12 sps:$4 sm:$0xff]  }
  0x4d   :  { %248 = vmatprep.subr.bf16.mxu0 %v1372_v15  ;;  %v1426_v60 = vld [vmem:[#allocation7 + $0xf4] ss:$12 sps:$4 sm:$0xff]   ;;  %v1424_v61 = vld [vmem:[#allocation7 + $0xf0] ss:$12 sps:$4 sm:$0xff]   ;;  %v1431_v62 = vld [vmem:[#allocation7 + $0x10c] ss:$12 sps:$4 sm:$0xff]  }
  0x4e   :  { %1311 = vmatpush3.bf16.msra.mxu1 %v1386_v22  ;;  %v1429_v63 = vld [vmem:[#allocation7 + $0x108] ss:$12 sps:$4 sm:$0xff]   ;;  %v1434_v3 = vld [vmem:[#allocation7 + $0x120] ss:$12 sps:$4 sm:$0xff]   ;;  %v1439_v5 = vld [vmem:[#allocation7 + $0x138] ss:$12 sps:$4 sm:$0xff]  }
  0x4f   :  { %1312 = vmatprep.subr.bf16.mxu1 %v1563_v1  ;;  %v1441_v4 = vld [vmem:[#allocation7 + $0x13c] ss:$12 sps:$4 sm:$0xff]   ;;  %v1446_v6 = vld [vmem:[#allocation7 + $0x154] ss:$12 sps:$4 sm:$0xff]   ;;  %v1447_v7 = vld [vmem:[#allocation7 + $0x158] ss:$12 sps:$4 sm:$0xff]  }
  0x50   :  { %249 = vmatpush1.bf16.msra.mxu0 %v1374_v17  ;;  %v1444_v8 = vld [vmem:[#allocation7 + $0x150] ss:$12 sps:$4 sm:$0xff]   ;;  %v1448_v9 = vld [vmem:[#allocation7 + $0x98] ss:$12 sps:$4 sm:$0xff]   ;;  %v1449_v12 = vld [vmem:[#allocation7 + $0x168] ss:$12 sps:$4 sm:$0xff]   ;;  %v338_v17 = vlaneseq }
  0x51   :  { %250 = vmatprep.subr.bf16.mxu0 %v1375_v18  ;;  %v1451_v10 = vld [vmem:[#allocation7 + $0x16c] ss:$12 sps:$4 sm:$0xff]   ;;  %v1452_v11 = vld [vmem:[#allocation7 + $0x170] ss:$12 sps:$4 sm:$0xff]   ;;  %v1566_v15 = vmov 1966171168  }
  0x52   :  { %1313 = vmatpush3.bf16.msra.mxu1 %v1387_v25  ;;  %v1453_v13 = vld [vmem:[#allocation7 + $0xb0] ss:$12 sps:$4 sm:$0xff]   ;;  %v336_v16 = vunpack.c.l.s4 %v1566_v15  ;;  %v339_v19 = vshrl.u32 %v338_v17, 7  ;;  %vm1152_vm1 = vcmask 7168  }
  0x53   :  { %1314 = vmatprep.subr.bf16.mxu1 %v1563_v1  ;;  %v1456_v14 = vld [vmem:[#allocation7 + $0x184] ss:$12 sps:$4 sm:$0xff]   ;;  %v1259_v17 = vld.sshfl [vmem:[%s1718_s4] sm:$0x13 pattern:$0x75316420] }
  0x54   :  { %251 = vmatpush1.bf16.msra.mxu0 %v1377_v20  ;;  %v337_v18 = vunpack.c.0.s8 %v336_v16  ;;  %v1186_v20 = vld.sshfl [vmem:[%s1716_s2] sm:$0x13 pattern:$0x75316420] }
  0x55   :  { %252 = vmatprep.subr.bf16.mxu0 %v1378_v21  ;;  %v334_v22 = vcombine.high %v1186_v20, %v1186_v20 }
  0x56   :  { %1315 = vmatpush3.bf16.msra.mxu1 %v1388_v29  ;;  %v1667_v21 = vsub.s32 %v337_v18, %v339_v19  ;;  %v1037_v18 = vcombine.high %v1259_v17, %v1259_v17 }
  0x57   :  { %1316 = vmatprep.subr.bf16.mxu1 %v1563_v1 }
  0x58   :  { %253 = vmatpush1.bf16.msra.mxu0 %v1380_v23  ;;  %v341_v23 = vrot.slane %v1186_v20, %v1667_v21  ;;  %v1051_v20 = vrot.slane %v1037_v18, %v1667_v21 }
  0x59   :  { %857 = vmatprep.subr.bf16.mxu0 %v1392_v24  ;;  %v348_v24 = vrot.slane %v334_v22, %v1667_v21 }
  0x5a   :  { %1317 = vmatpush3.bf16.msra.mxu1 %v1389_v32  ;;  %v351_v25 = vpack.i.b16 %v341_v23, %v341_v23 }
  0x5b   :  { %271 = vmatmul.mubr.bf16.vlgmr.msra.gmra.mrb[0].mxu0 %v1382_v26  ;;  %1271 = vmatprep.subr.bf16.mxu1 %v1417_v33 }
  0x5c   :  { %858 = vmatpush1.bf16.msra.mxu0 %v1390_v27  ;;  %v358_v27 = vpack.i.b16 %v348_v24, %v348_v24 }
  0x5d   :  { %859 = vmatprep.subr.bf16.mxu0 %v1395_v28  ;;  %1319 = vmatmul.mubr.bf16.vlgmr.msra.gmra.mrb[0].mxu1 %v1382_v26  ;;  %v1671_v26 = vsub.s32 0, %v339_v19  ;;  %v1044_v19 = vrot.slane %v1259_v17, %v1667_v21 }
  0x5e   :  { %1272 = vmatpush3.bf16.msra.mxu1 %v1418_v36 }
  0x5f   :  { %1273 = vmatprep.subr.bf16.mxu1 %v1422_v37  ;;  %v363_v32 = vrot.slane %v358_v27, %v1671_v26  ;;  %v1061_v27 = vpack.i.b16 %v1051_v20, %v1051_v20 }
  0x60   :  { %860 = vmatpush1.bf16.msra.mxu0 %v1393_v30  ;;  %v356_v30 = vrot.slane %v351_v25, %v1671_v26  ;;  %v1054_v25 = vpack.i.b16 %v1044_v19, %v1044_v19 }
  0x61   :  { %861 = vmatprep.subr.bf16.mxu0 %v1398_v31 }
  0x62   :  { %1274 = vmatpush3.bf16.msra.mxu1 %v1423_v40  ;;  %v1457_v40 = vld [vmem:[#allocation7 + $0x188] ss:$12 sps:$4 sm:$0xff]  }
  0x63   :  { %1275 = vmatprep.subr.bf16.mxu1 %v1427_v41 }
  0x64   :  { %862 = vmatpush1.bf16.msra.mxu0 %v1396_v34 }
  0x65   :  { %863 = vmatprep.subr.bf16.mxu0 %v1401_v35 }
  0x66   :  { %1276 = vmatpush3.bf16.msra.mxu1 %v1428_v45  ;;  %v1458_v45 = vld [vmem:[#allocation7 + $0x198] ss:$12 sps:$4 sm:$0xff]  }
  0x67   :  { %1277 = vmatprep.subr.bf16.mxu1 %v1432_v47 }
  0x68   :  { %864 = vmatpush1.bf16.msra.mxu0 %v1399_v38 }
  0x69   :  { %865 = vmatprep.subr.bf16.mxu0 %v1404_v39  ;;  %v1454_v39 = vld [vmem:[#allocation7 + $0x180] ss:$12 sps:$4 sm:$0xff]  }
  0x6a   :  { %1278 = vmatpush3.bf16.msra.mxu1 %v1433_v48  ;;  %v1464_v48 = vld [vmem:[#allocation7 + $0x1b4] ss:$12 sps:$4 sm:$0xff]  }
  0x6b   :  { %1279 = vmatprep.subr.bf16.mxu1 %v1437_v49 }
  0x6c   :  { %866 = vmatpush1.bf16.msra.mxu0 %v1402_v42  ;;  %v1460_v42 = vld [vmem:[#allocation7 + $0x19c] ss:$12 sps:$4 sm:$0xff]  }
  0x6d   :  { %867 = vmatprep.subr.bf16.mxu0 %v1407_v43 }
  0x6e   :  { %1280 = vmatpush3.bf16.msra.mxu1 %v1438_v52  ;;  %v1465_v52 = vld [vmem:[#allocation7 + $0x1b8] ss:$12 sps:$4 sm:$0xff]  }
  0x6f   :  { %1281 = vmatprep.subr.bf16.mxu1 %v1442_v53  ;;  %v1468_v53 = vld [vmem:[#allocation7 + $0x1cc] ss:$12 sps:$4 sm:$0xff]  }
  0x70   :  { %868 = vmatpush1.bf16.msra.mxu0 %v1405_v44 }
  0x71   :  { %869 = vmatprep.subr.bf16.mxu0 %v1410_v46  ;;  %v1461_v46 = vld [vmem:[#allocation7 + $0x1a0] ss:$12 sps:$4 sm:$0xff]  }
  0x72   :  { %1282 = vmatpush3.bf16.msra.mxu1 %v1443_v56  ;;  %v1472_v56 = vld [vmem:[#allocation7 + $0x1e4] ss:$12 sps:$4 sm:$0xff]  }
  0x73   :  { %1283 = vmatprep.subr.bf16.mxu1 %v1447_v7  ;;  %v1482_v7 = vld [vmem:[#allocation7 + $0x228] ss:$12 sps:$4 sm:$0xff]  }
  0x74   :  { %870 = vmatpush1.bf16.msra.mxu0 %v1408_v50 }
  0x75   :  { %871 = vmatprep.subr.bf16.mxu0 %v1413_v51  ;;  %v1462_v51 = vld [vmem:[#allocation7 + $0x1b0] ss:$12 sps:$4 sm:$0xff]  }
  0x76   :  { %1284 = vmatpush3.bf16.msra.mxu1 %v1448_v9 }
  0x77   :  { %1285 = vmatprep.subr.bf16.mxu1 %v1452_v11 }
  0x78   :  { %872 = vmatpush1.bf16.msra.mxu0 %v1411_v54  ;;  %v1466_v54 = vld [vmem:[#allocation7 + $0x1c8] ss:$12 sps:$4 sm:$0xff]  }
  0x79   :  { %873 = vmatprep.subr.bf16.mxu0 %v1416_v55  ;;  %v1469_v55 = vld [vmem:[#allocation7 + $0x1d0] ss:$12 sps:$4 sm:$0xff]  }
  0x7a   :  { %1286 = vmatpush3.bf16.msra.mxu1 %v1453_v13 }
  0x7b   :  { %1322 = vmatprep.subr.bf16.mxu1 %v1563_v1 }
  0x7c   :  { %874 = vmatpush1.bf16.msra.mxu0 %v1414_v57  ;;  %v1470_v57 = vld [vmem:[#allocation7 + $0x1e0] ss:$12 sps:$4 sm:$0xff]  }
  0x7d   :  { %875 = vmatprep.subr.bf16.mxu0 %v1421_v58  ;;  %v1473_v58 = vld [vmem:[#allocation7 + $0x1e8] ss:$12 sps:$4 sm:$0xff]  }
  0x80   :  { %876 = vmatpush1.bf16.msra.mxu0 %v1419_v59  ;;  %v1476_v59 = vld [vmem:[#allocation7 + $0x1fc] ss:$12 sps:$4 sm:$0xff]  }
  0x81   :  { %877 = vmatprep.subr.bf16.mxu0 %v1426_v60  ;;  %v349_v60 = vcombine.high %v341_v23, %v341_v23  ;;  %v1052_v23 = vcombine.high %v1044_v19, %v1044_v19 }
  0x84   :  { %878 = vmatpush1.bf16.msra.mxu0 %v1424_v61  ;;  %v1474_v61 = vld [vmem:[#allocation7 + $0x1f8] ss:$12 sps:$4 sm:$0xff]  }
  0x85   :  { %879 = vmatprep.subr.bf16.mxu0 %v1431_v62  ;;  %v1477_v62 = vld [vmem:[#allocation7 + $0x200] ss:$12 sps:$4 sm:$0xff]  }
  0x88   :  { %880 = vmatpush1.bf16.msra.mxu0 %v1429_v63  ;;  %v365_v63 = vpack.i.b16 %v349_v60, %v349_v60 }
  0x89   :  { %881 = vmatprep.subr.bf16.mxu0 %v1436_v0  ;;  %v1480_v0 = vld [vmem:[#allocation7 + $0x214] ss:$12 sps:$4 sm:$0xff]  }
  0x8c   :  { %882 = vmatpush1.bf16.msra.mxu0 %v1434_v3  ;;  %v1478_v3 = vld [vmem:[#allocation7 + $0x210] ss:$12 sps:$4 sm:$0xff]  }
  0x8d   :  { %883 = vmatprep.subr.bf16.mxu0 %v1441_v4  ;;  %v1481_v4 = vld [vmem:[#allocation7 + $0x218] ss:$12 sps:$4 sm:$0xff]  }
  0x90   :  { %884 = vmatpush1.bf16.msra.mxu0 %v1439_v5  ;;  %v370_v5 = vrot.slane %v365_v63, %v1671_v26 }
  0x91   :  { %885 = vmatprep.subr.bf16.mxu0 %v1446_v6  ;;  %v1484_v6 = vld [vmem:[#allocation7 + $0x22c] ss:$12 sps:$4 sm:$0xff]  }
  0x94   :  { %886 = vmatpush1.bf16.msra.mxu0 %v1444_v8  ;;  %v1485_v8 = vld [vmem:[#allocation7 + $0x230] ss:$12 sps:$4 sm:$0xff]  }
  0x95   :  { %887 = vmatprep.subr.bf16.mxu0 %v1451_v10 }
  0x98   :  { %888 = vmatpush1.bf16.msra.mxu0 %v1449_v12 }
  0x99   :  { %900 = vmatprep.subr.bf16.mxu0 %v1456_v14 }
 0x12e   :  { %v272_v28 = vpop.f32.mrb[0].mxu0 }
 0x12f   :  { %v274_v29 = vpop.f32.mrb[1].mxu0 }
 0x130   :  { %v276_v31 = vpop.f32.mrb[2].mxu0  ;;  %v315_v43 = vpop.f32.mrb[0].mxu1 }
 0x131   :  { %v322_v33 = vpack.c.bf16 %v276_v31, %v272_v28  ;;  %v278_v34 = vpop.f32.mrb[3].mxu0  ;;  %v1320_v44 = vpop.f32.mrb[1].mxu1 }
 0x132   :  { %v323_v35 = vpack.c.bf16 %v278_v34, %v274_v29  ;;  %v318_v47 = vpop.f32.mrb[2].mxu1  ;;  %v1068_v29 = vpack.i.b16 %v1052_v23, %v1052_v23 }
 0x133   :  { %v371_v36 = vadd.bf16 %v356_v30, %v322_v33  ;;  %v324_v49 = vpack.c.bf16 %v318_v47, %v315_v43  ;;  %v1321_v50 = vpop.f32.mrb[3].mxu1 }
 0x134   :  { %v372_v37 = vadd.bf16 %v363_v32, %v323_v35  ;;  %v1073_v44 = vrot.slane %v1068_v29, %v1671_v26 }
 0x135   :  { %v374_v41 = vmax.bf16 %v1564_v2, %v371_v36  ;;  %v373_v9 = vadd.bf16 %v370_v5, %v324_v49  ;;  %v1059_v36 = vrot.slane %v1054_v25, %v1671_v26 }
 0x136   :  { %v375_v38 = vmax.bf16 %v1564_v2, %v372_v37 }
 0x137   :  { %v376_v10 = vmax.bf16 %v1564_v2, %v373_v9 }
 0x138   :  { %889 = vmatprep.mubr.bf16.mxu0 %v375_v38  ;;  %975 = vmatprep.mubr.bf16.mxu1 %v375_v38 }
 0x139   :  { %890 = vmatmul.mubr.bf16.vlgmr.msra.gmra.mrb[4].mxu0 %v374_v41  ;;  %976 = vmatmul.mubr.bf16.vlgmr.msra.gmra.mrb[4].mxu1 %v374_v41 }
 0x13a   :  { %901 = vmatpush1.bf16.msra.mxu0 %v1454_v39  ;;  %1323 = vmatpush3.bf16.msra.mxu1 %v1457_v40  ;;  %v1066_v40 = vrot.slane %v1061_v27, %v1671_v26 }
 0x13b   :  { %902 = vmatprep.subr.bf16.mxu0 %v1460_v42  ;;  %1324 = vmatprep.subr.bf16.mxu1 %v1563_v1 }
 0x13c   :  { %932 = vmatprep.mubr.bf16.mxu0 %v1564_v2  ;;  %1338 = vmatprep.mubr.msk.bf16.mxu1 %vm1565_vm0, %v1563_v1 }
 0x13e   :  { %903 = vmatpush1.bf16.msra.mxu0 %v1458_v45  ;;  %1325 = vmatpush3.bf16.msra.mxu1 %v1461_v46 }
 0x13f   :  { %904 = vmatprep.subr.bf16.mxu0 %v1464_v48  ;;  %1326 = vmatprep.subr.bf16.mxu1 %v1563_v1 }
 0x142   :  { %905 = vmatpush1.bf16.msra.mxu0 %v1462_v51  ;;  %1327 = vmatpush3.bf16.msra.mxu1 %v1465_v52 }
 0x143   :  { %906 = vmatprep.subr.bf16.mxu0 %v1468_v53  ;;  %1328 = vmatprep.subr.bf16.mxu1 %v1563_v1 }
 0x146   :  { %907 = vmatpush1.bf16.msra.mxu0 %v1466_v54  ;;  %1329 = vmatpush3.bf16.msra.mxu1 %v1469_v55 }
 0x147   :  { %908 = vmatprep.subr.bf16.mxu0 %v1472_v56  ;;  %1330 = vmatprep.subr.bf16.mxu1 %v1563_v1 }
 0x14a   :  { %909 = vmatpush1.bf16.msra.mxu0 %v1470_v57  ;;  %1331 = vmatpush3.bf16.msra.mxu1 %v1473_v58 }
 0x14b   :  { %910 = vmatprep.subr.bf16.mxu0 %v1476_v59  ;;  %1332 = vmatprep.subr.bf16.mxu1 %v1563_v1 }
 0x14e   :  { %911 = vmatpush1.bf16.msra.mxu0 %v1474_v61  ;;  %1333 = vmatpush3.bf16.msra.mxu1 %v1477_v62 }
 0x14f   :  { %912 = vmatprep.subr.bf16.mxu0 %v1480_v0  ;;  %1334 = vmatprep.subr.bf16.mxu1 %v1563_v1 }
 0x152   :  { %913 = vmatpush1.bf16.msra.mxu0 %v1478_v3  ;;  %1335 = vmatpush3.bf16.msra.mxu1 %v1481_v4 }
 0x153   :  { %914 = vmatprep.subr.bf16.mxu0 %v1484_v6  ;;  %1336 = vmatprep.subr.bf16.mxu1 %v1563_v1  ;;  %v1260_v1 = vld.sshfl [vmem:[%s1719_s5] sm:$0x13 pattern:$0x75316420] }
 0x154   :  { %v1089_v22 = vcombine.high %v1260_v1, %v1260_v1  ;;  %v1096_v24 = vrot.slane %v1260_v1, %v1667_v21 }
 0x156   :  { %915 = vmatpush1.bf16.msra.mxu0 %v1482_v7  ;;  %1337 = vmatpush3.bf16.msra.mxu1 %v1485_v8  ;;  %v1103_v28 = vrot.slane %v1089_v22, %v1667_v21  ;;  %v1104_v30 = vcombine.high %v1096_v24, %v1096_v24  ;;  %v1106_v37 = vpack.i.b16 %v1096_v24, %v1096_v24 }
 0x158   :  { %v1113_v41 = vpack.i.b16 %v1103_v28, %v1103_v28  ;;  %v1120_v46 = vpack.i.b16 %v1104_v30, %v1104_v30  ;;  %v1111_v50 = vrot.slane %v1106_v37, %v1671_v26 }
 0x159   :  { %933 = vmatmul.mubr.bf16.vlgmr.msra.gmra.mrb[4].mxu0 %v376_v10  ;;  %1339 = vmatmul.mubr.bf16.vlgmr.msra.gmra.mrb[8].mxu1 %v376_v10 }
 0x15a   :  { %v1118_v52 = vrot.slane %v1113_v41, %v1671_v26  ;;  %v1125_v55 = vrot.slane %v1120_v46, %v1671_v26  ;;  %v1261_v26 = vld [vmem:[#allocation2] ss:$0 sm:$0xff] }
 0x20c   :  { %v1287_v11 = vpop.f32.mrb[4].mxu1 }
 0x20d   :  { %v1288_v12 = vpop.f32.mrb[5].mxu1 }
 0x20e   :  { %v1289_v13 = vadd.f32 %v1288_v12, %v1287_v11  ;;  %v1290_v14 = vpop.f32.mrb[6].mxu1 }
 0x20f   :  { %v1291_v15 = vpop.f32.mrb[7].mxu1 }
 0x210   :  { %v1292_v16 = vadd.f32 %v1291_v15, %v1290_v14 }
 0x22c   :  { %v934_v31 = vpop.f32.mrb[4].mxu0  ;;  %v1018_v32 = vpop.f32.mrb[8].mxu1 }
 0x22d   :  { %v1019_v33 = vadd.f32 %v1289_v13, %v1018_v32  ;;  %v936_v34 = vpop.f32.mrb[5].mxu0  ;;  %v1340_v35 = vpop.f32.mrb[9].mxu1 }
 0x22e   :  { %v938_v38 = vpop.f32.mrb[6].mxu0  ;;  %v1021_v39 = vpop.f32.mrb[10].mxu1 }
 0x22f   :  { %v1025_v42 = vpack.c.bf16 %v938_v38, %v934_v31  ;;  %v1022_v43 = vadd.f32 %v1292_v16, %v1021_v39  ;;  %v940_v21 = vpop.f32.mrb[7].mxu0  ;;  %v1341_v45 = vpop.f32.mrb[11].mxu1 }
 0x230   :  { %v1026_v47 = vpack.c.bf16 %v940_v21, %v936_v34 }
 0x231   :  { %v1074_v48 = vadd.bf16 %v1059_v36, %v1025_v42  ;;  %v1027_v49 = vpack.c.bf16 %v1022_v43, %v1019_v33 }
 0x232   :  { %v1075_v51 = vadd.bf16 %v1066_v40, %v1026_v47 }
 0x233   :  { %v1077_v53 = vmax.bf16 %v1564_v2, %v1074_v48  ;;  %v1076_v54 = vadd.bf16 %v1073_v44, %v1027_v49 }
 0x234   :  { %v1078_v56 = vmax.bf16 %v1564_v2, %v1075_v51 }
 0x235   :  { %v1079_v57 = vmax.bf16 %v1564_v2, %v1076_v54  ;;  %v1126_v58 = vmul.bf16 %v1111_v50, %v1077_v53 }
 0x236   :  { %v1127_v59 = vmul.bf16 %v1118_v52, %v1078_v56 }
 0x237   :  { %v1128_v60 = vmul.bf16 %v1125_v55, %v1079_v57  ;;  %v1129_v61 = vunpack.c.l.bf16 %v1126_v58  ;;  %v1132_v62 = vunpack.c.h.bf16 %v1126_v58 }
 0x238   :  { %v1130_v63 = vunpack.c.l.bf16 %v1127_v59  ;;  %v1133_v0 = vunpack.c.h.bf16 %v1127_v59 }
 0x239   :  { %v1131_v3 = vunpack.c.l.bf16 %v1128_v60  ;;  %v1134_v4 = vunpack.c.h.bf16 %v1128_v60 }
 0x23a   :  { %v1135_v5 = vadd.f32 %v1130_v63, %v1129_v61  ;;  %v1139_v6 = vadd.f32 %v1133_v0, %v1132_v62 }
 0x23c   :  { %v1136_v7 = vadd.f32 %v1135_v5, %v1131_v3  ;;  %v1140_v8 = vadd.f32 %v1139_v6, %v1134_v4 }
 0x23e   :  { %1137 = vadd.xlane.f32.xlu0 %v1136_v7 }
 0x242   :  { %1141 = vadd.xlane.f32.xlu0 %v1140_v8 }
 0x2cb   :  { %v1138_v9 = vpop.xlane.xlu0 %1137 }
 0x2cc   :  { %v1150_v10 = vadd.f32 %v1261_v26, %v1138_v9 }
 0x2ce   :  { %1153 = vst.msk [vmem:[%s1721_s7] sm:$0xff] %vm1152_vm1, %v1150_v10 }
 0x2cf   :  { %v1142_v2 = vpop.xlane.xlu0 %1141 }
 0x2d0   :  { %v1151_v11 = vadd.f32 %v1261_v26, %v1142_v2 }
 0x2d2   :  { %1154 = vst.msk [vmem:[%s1721_s7 + $0x8] sm:$0xff] %vm1152_vm1, %v1151_v11 }
 0x2d3   :  { %1159 = vsyncpa [#allocation4], 1 }
 0x2d4   :  { %1160 = vsyncpa [#allocation6], 1 }

</bundles_post_ra>
